<compile_context>
chip_gen: v5e
topology: v5e:2x2
jax: 0.10.0
libtpu: 0.0.40
codegen_flags: <defaults>
</compile_context>

<pallas_src>
import functools
import math

import jax
import jax.numpy as jnp
from jax.experimental import pallas as pl
from jax.experimental.pallas import tpu as pltpu


# ----------------------------- config ---------------------------------------
class Config:
    emb_dim = 32
    num_heads = 4
    attn_drop_rate = 0.1  # dropout is identity in eval mode (see TODO below)


# ----------------------------- kernel ---------------------------------------
def _mhsa_kernel(x_ref, wqkv_ref, bqkv_ref, wo_ref, bo_ref, o_ref, *,
                 num_heads, head_dim):
    """Whole-problem kernel (no grid).

    x_ref:    (B, S, E)    VMEM
    wqkv_ref: (E, 3E)      VMEM  (y = x @ W + b layout, [Q*scale | K | V] cols)
    bqkv_ref: (1, 3E)      VMEM  ([bq*scale | bk | bv])
    wo_ref:   (E, E)       VMEM
    bo_ref:   (1, E)       VMEM
    o_ref:    (B, S, E)    VMEM
    """
    B, S, E = x_ref.shape

    # Fused QKV projection on the flattened (B*S, E) activations. The score
    # scale is already folded into the Q columns by the wrapper.
    x2 = x_ref[...].reshape(B * S, E)                        # layout-free merge
    qkv = jnp.dot(x2, wqkv_ref[...],
                  preferred_element_type=jnp.float32) + bqkv_ref[...]
    qkv = qkv.reshape(B, S, 3 * E)                           # layout-free split

    # Full-width f32 accumulator for the output projection (per-head
    # contributions added below; bias added once at the end).
    acc = jnp.zeros((B * S, E), jnp.float32)

    # Per-head attention, batched over the batch dim with 3-D einsums. Heads
    # are contiguous lane slices of the fused projection output.
    for h in range(num_heads):
        lo = h * head_dim
        hi = lo + head_dim
        q_h = qkv[:, :, lo:hi]                               # (B, S, D), pre-scaled
        k_h = qkv[:, :, E + lo:E + hi]                       # (B, S, D)
        v_h = qkv[:, :, 2 * E + lo:2 * E + hi]               # (B, S, D)

        # scores = (Q/sqrt(D)) K^T; contract last dims directly (no .T).
        s = jnp.einsum('bqd,bkd->bqk', q_h, k_h,
                       preferred_element_type=jnp.float32)

        # TODO(synk): optional additive mask (scores -= 10000*(1-mask)) not
        # wired in; reference default is mask=None.

        # Numerically stable softmax; EUP approx reciprocal + one Newton step.
        m = jnp.max(s, axis=-1, keepdims=True)
        p = jnp.exp(s - m)
        d = jnp.sum(p, axis=-1, keepdims=True)
        r = pl.reciprocal(d, approx=True)
        r = r * (2.0 - d * r)                                # Newton refinement
        p = p * r

        # TODO(synk): attn_dropout is identity here (eval-mode semantics).

        # Z_h = P V_h, then straight through the sublane-aligned 8-row slice
        # of Wo into the accumulator (no concat, no intermediate stores).
        z_h = jnp.einsum('bqk,bkd->bqd', p, v_h,
                         preferred_element_type=jnp.float32)
        acc = acc + jnp.dot(z_h.reshape(B * S, head_dim),   # layout-free merge
                            wo_ref[lo:hi, :],
                            preferred_element_type=jnp.float32)

    out = acc + bo_ref[...]
    o_ref[...] = out.reshape(B, S, E).astype(o_ref.dtype)


# ----------------------------- wrapper ---------------------------------------
def mhsa_forward(x, params, *, num_heads):
    """x: (B, S, E) float32. params: (E,E) weights / (1,E) biases, y = x@W+b."""
    B, S, E = x.shape
    head_dim = E // num_heads
    scale = 1.0 / math.sqrt(head_dim)

    # Pack [Q*scale | K | V] into one (E, 3E) weight and (1, 3E) bias at trace
    # time: a single fused projection matmul, and the 1/sqrt(D) score scaling
    # is free ((q*c)·k = c·(q·k)).
    wqkv = jnp.concatenate(
        [params["wq"] * scale, params["wk"], params["wv"]], axis=1)
    bqkv = jnp.concatenate(
        [params["bq"] * scale, params["bk"], params["bv"]], axis=1)

    kernel = functools.partial(_mhsa_kernel, num_heads=num_heads,
                               head_dim=head_dim)

    vmem = pl.BlockSpec(memory_space=pltpu.MemorySpace.VMEM)

    # Single kernel invocation (no grid): at these toy shapes the cost is
    # launch/DMA latency, so per-grid-step overhead would dominate.
    # TODO(synk): for production-sized B/S, add a batch/q-block grid axis
    # marked "parallel" (v7x megacore) with weight BlockSpecs whose index_map
    # is constant across it, and bf16 MXU operands.
    return pl.pallas_call(
        kernel,
        out_shape=jax.ShapeDtypeStruct((B, S, E), x.dtype),
        in_specs=[vmem, vmem, vmem, vmem, vmem],
        out_specs=vmem,
    )(x, wqkv, bqkv, params["wo"], params["bo"])


# ----------------------------- reference -------------------------------------
def mhsa_reference(x, params, *, num_heads):
    B, S, E = x.shape
    D = E // num_heads
    q = x @ params["wq"] + params["bq"]
    k = x @ params["wk"] + params["bk"]
    v = x @ params["wv"] + params["bv"]
    q = q.reshape(B, S, num_heads, D).transpose(0, 2, 1, 3)
    k = k.reshape(B, S, num_heads, D).transpose(0, 2, 1, 3)
    v = v.reshape(B, S, num_heads, D).transpose(0, 2, 1, 3)
    scores = jnp.einsum("bhqd,bhkd->bhqk", q, k) / jnp.sqrt(float(D))
    scores = jax.nn.softmax(scores, axis=-1)
    z = jnp.einsum("bhqk,bhkd->bhqd", scores, v)
    z = z.transpose(0, 2, 1, 3).reshape(B, S, E)
    return z @ params["wo"] + params["bo"]


# ----------------------------- main ------------------------------------------
if __name__ == "__main__":
    cfg = Config()
    B, S, E = 2, 8, cfg.emb_dim

    key = jax.random.PRNGKey(0)
    keys = jax.random.split(key, 9)

    # Deterministic parameter init, PyTorch-Linear-style uniform(+-1/sqrt(in)).
    bound = 1.0 / math.sqrt(E)

    def uinit(k, shape):
        return jax.random.uniform(k, shape, jnp.float32, -bound, bound)

    params = {
        "wq": uinit(keys[0], (E, E)), "bq": uinit(keys[1], (1, E)),
        "wk": uinit(keys[2], (E, E)), "bk": uinit(keys[3], (1, E)),
        "wv": uinit(keys[4], (E, E)), "bv": uinit(keys[5], (1, E)),
        "wo": uinit(keys[6], (E, E)), "bo": uinit(keys[7], (1, E)),
    }

    x = jax.random.normal(keys[8], (B, S, E), jnp.float32)

    out = mhsa_forward(x, params, num_heads=cfg.num_heads)
    out = jax.block_until_ready(out)

    ref = mhsa_reference(x, params, num_heads=cfg.num_heads)
    assert out.shape == (B, S, E)
    assert jnp.allclose(out, ref, atol=2e-5, rtol=2e-5), "mismatch vs reference"

    print("KERNEL_OK")
</pallas_src>

<mosaic_0001>
module attributes {stable_mosaic.version = 11 : i64} {
  func.func @_mhsa_kernel(%arg0: memref<2x8x32xf32, #tpu.memory_space<vmem>>, %arg1: memref<32x96xf32, #tpu.memory_space<vmem>>, %arg2: memref<1x96xf32, #tpu.memory_space<vmem>>, %arg3: memref<32x32xf32, #tpu.memory_space<vmem>>, %arg4: memref<1x32xf32, #tpu.memory_space<vmem>>, %arg5: memref<2x8x32xf32, #tpu.memory_space<vmem>>) attributes {dimension_semantics = [], scalar_prefetch = 0 : i64, scratch_operands = 0 : i64, tpu.core_type = #tpu.core_type<tc>} {
    %c0 = arith.constant 0 : index
    %c0_0 = arith.constant 0 : index
    %c0_1 = arith.constant 0 : index
    %0 = vector.load %arg0[%c0, %c0_0, %c0_1] : memref<2x8x32xf32, #tpu.memory_space<vmem>>, vector<2x8x32xf32>
    %1 = vector.shape_cast %0 : vector<2x8x32xf32> to vector<16x32xf32>
    %c0_2 = arith.constant 0 : index
    %c0_3 = arith.constant 0 : index
    %2 = vector.load %arg1[%c0_2, %c0_3] : memref<32x96xf32, #tpu.memory_space<vmem>>, vector<32x96xf32>
    %cst = arith.constant dense<0.000000e+00> : vector<16x96xf32>
    %3 = tpu.matmul %1, %2, %cst {dimension_numbers = #tpu.dot_dimension_numbers<[1], [0], [0], [1], [0, 0, 1, 1], [], []>} : vector<16x32xf32>, vector<32x96xf32>, vector<16x96xf32> -> vector<16x96xf32>
    %c0_4 = arith.constant 0 : index
    %c0_5 = arith.constant 0 : index
    %4 = vector.load %arg2[%c0_4, %c0_5] : memref<1x96xf32, #tpu.memory_space<vmem>>, vector<1x96xf32>
    %5 = vector.broadcast %4 : vector<1x96xf32> to vector<16x96xf32>
    %6 = arith.addf %3, %5 : vector<16x96xf32>
    %7 = vector.shape_cast %6 : vector<16x96xf32> to vector<2x8x96xf32>
    %cst_6 = arith.constant 0.000000e+00 : f32
    %8 = vector.broadcast %cst_6 : f32 to vector<16x32xf32>
    %9 = vector.extract_strided_slice %7 {offsets = [0, 0, 0], sizes = [2, 8, 8], strides = [1, 1, 1]} : vector<2x8x96xf32> to vector<2x8x8xf32>
    %10 = vector.extract_strided_slice %7 {offsets = [0, 0, 32], sizes = [2, 8, 8], strides = [1, 1, 1]} : vector<2x8x96xf32> to vector<2x8x8xf32>
    %11 = vector.extract_strided_slice %7 {offsets = [0, 0, 64], sizes = [2, 8, 8], strides = [1, 1, 1]} : vector<2x8x96xf32> to vector<2x8x8xf32>
    "tpu.trace_start"() <{level = 10 : i32, message = "bqd,bkd->bqk"}> : () -> ()
    %cst_7 = arith.constant dense<0.000000e+00> : vector<2x8x8xf32>
    %12 = tpu.matmul %9, %10, %cst_7 {dimension_numbers = #tpu.dot_dimension_numbers<[2], [2], [1], [1], [0, 0, 0, 1, 1, 1], [0], [0]>} : vector<2x8x8xf32>, vector<2x8x8xf32>, vector<2x8x8xf32> -> vector<2x8x8xf32>
    "tpu.trace_stop"() : () -> ()
    %cst_8 = arith.constant dense<0xFF800000> : vector<2x8xf32>
    %13 = vector.multi_reduction <maximumf>, %12, %cst_8 [2] : vector<2x8x8xf32> to vector<2x8xf32>
    %14 = vector.shape_cast %13 : vector<2x8xf32> to vector<2x8x1xf32>
    %15 = vector.broadcast %14 : vector<2x8x1xf32> to vector<2x8x8xf32>
    %16 = arith.subf %12, %15 : vector<2x8x8xf32>
    %17 = math.exp %16 : vector<2x8x8xf32>
    %cst_9 = arith.constant dense<0.000000e+00> : vector<2x8xf32>
    %18 = vector.multi_reduction <add>, %17, %cst_9 [2] : vector<2x8x8xf32> to vector<2x8xf32>
    %19 = vector.shape_cast %18 : vector<2x8xf32> to vector<2x8x1xf32>
    %20 = tpu.reciprocal %19 {approx = true} : vector<2x8x1xf32> -> vector<2x8x1xf32>
    %21 = arith.mulf %19, %20 : vector<2x8x1xf32>
    %cst_10 = arith.constant 2.000000e+00 : f32
    %22 = vector.broadcast %cst_10 : f32 to vector<2x8x1xf32>
    %23 = arith.subf %22, %21 : vector<2x8x1xf32>
    %24 = arith.mulf %20, %23 : vector<2x8x1xf32>
    %25 = vector.broadcast %24 : vector<2x8x1xf32> to vector<2x8x8xf32>
    %26 = arith.mulf %17, %25 : vector<2x8x8xf32>
    "tpu.trace_start"() <{level = 10 : i32, message = "bqk,bkd->bqd"}> : () -> ()
    %cst_11 = arith.constant dense<0.000000e+00> : vector<2x8x8xf32>
    %27 = tpu.matmul %26, %11, %cst_11 {dimension_numbers = #tpu.dot_dimension_numbers<[2], [1], [1], [2], [0, 0, 0, 1, 1, 2], [0], [0]>} : vector<2x8x8xf32>, vector<2x8x8xf32>, vector<2x8x8xf32> -> vector<2x8x8xf32>
    "tpu.trace_stop"() : () -> ()
    %28 = vector.shape_cast %27 : vector<2x8x8xf32> to vector<16x8xf32>
    %c0_12 = arith.constant 0 : index
    %c0_13 = arith.constant 0 : index
    %29 = vector.load %arg3[%c0_12, %c0_13] : memref<32x32xf32, #tpu.memory_space<vmem>>, vector<8x32xf32>
    %cst_14 = arith.constant dense<0.000000e+00> : vector<16x32xf32>
    %30 = tpu.matmul %28, %29, %cst_14 {dimension_numbers = #tpu.dot_dimension_numbers<[1], [0], [0], [1], [0, 0, 1, 1], [], []>} : vector<16x8xf32>, vector<8x32xf32>, vector<16x32xf32> -> vector<16x32xf32>
    %31 = arith.addf %8, %30 : vector<16x32xf32>
    %32 = vector.extract_strided_slice %7 {offsets = [0, 0, 8], sizes = [2, 8, 8], strides = [1, 1, 1]} : vector<2x8x96xf32> to vector<2x8x8xf32>
    %33 = vector.extract_strided_slice %7 {offsets = [0, 0, 40], sizes = [2, 8, 8], strides = [1, 1, 1]} : vector<2x8x96xf32> to vector<2x8x8xf32>
    %34 = vector.extract_strided_slice %7 {offsets = [0, 0, 72], sizes = [2, 8, 8], strides = [1, 1, 1]} : vector<2x8x96xf32> to vector<2x8x8xf32>
    "tpu.trace_start"() <{level = 10 : i32, message = "bqd,bkd->bqk"}> : () -> ()
    %cst_15 = arith.constant dense<0.000000e+00> : vector<2x8x8xf32>
    %35 = tpu.matmul %32, %33, %cst_15 {dimension_numbers = #tpu.dot_dimension_numbers<[2], [2], [1], [1], [0, 0, 0, 1, 1, 1], [0], [0]>} : vector<2x8x8xf32>, vector<2x8x8xf32>, vector<2x8x8xf32> -> vector<2x8x8xf32>
    "tpu.trace_stop"() : () -> ()
    %cst_16 = arith.constant dense<0xFF800000> : vector<2x8xf32>
    %36 = vector.multi_reduction <maximumf>, %35, %cst_16 [2] : vector<2x8x8xf32> to vector<2x8xf32>
    %37 = vector.shape_cast %36 : vector<2x8xf32> to vector<2x8x1xf32>
    %38 = vector.broadcast %37 : vector<2x8x1xf32> to vector<2x8x8xf32>
    %39 = arith.subf %35, %38 : vector<2x8x8xf32>
    %40 = math.exp %39 : vector<2x8x8xf32>
    %cst_17 = arith.constant dense<0.000000e+00> : vector<2x8xf32>
    %41 = vector.multi_reduction <add>, %40, %cst_17 [2] : vector<2x8x8xf32> to vector<2x8xf32>
    %42 = vector.shape_cast %41 : vector<2x8xf32> to vector<2x8x1xf32>
    %43 = tpu.reciprocal %42 {approx = true} : vector<2x8x1xf32> -> vector<2x8x1xf32>
    %44 = arith.mulf %42, %43 : vector<2x8x1xf32>
    %cst_18 = arith.constant 2.000000e+00 : f32
    %45 = vector.broadcast %cst_18 : f32 to vector<2x8x1xf32>
    %46 = arith.subf %45, %44 : vector<2x8x1xf32>
    %47 = arith.mulf %43, %46 : vector<2x8x1xf32>
    %48 = vector.broadcast %47 : vector<2x8x1xf32> to vector<2x8x8xf32>
    %49 = arith.mulf %40, %48 : vector<2x8x8xf32>
    "tpu.trace_start"() <{level = 10 : i32, message = "bqk,bkd->bqd"}> : () -> ()
    %cst_19 = arith.constant dense<0.000000e+00> : vector<2x8x8xf32>
    %50 = tpu.matmul %49, %34, %cst_19 {dimension_numbers = #tpu.dot_dimension_numbers<[2], [1], [1], [2], [0, 0, 0, 1, 1, 2], [0], [0]>} : vector<2x8x8xf32>, vector<2x8x8xf32>, vector<2x8x8xf32> -> vector<2x8x8xf32>
    "tpu.trace_stop"() : () -> ()
    %51 = vector.shape_cast %50 : vector<2x8x8xf32> to vector<16x8xf32>
    %c8 = arith.constant 8 : index
    %c0_20 = arith.constant 0 : index
    %52 = vector.load %arg3[%c8, %c0_20] : memref<32x32xf32, #tpu.memory_space<vmem>>, vector<8x32xf32>
    %cst_21 = arith.constant dense<0.000000e+00> : vector<16x32xf32>
    %53 = tpu.matmul %51, %52, %cst_21 {dimension_numbers = #tpu.dot_dimension_numbers<[1], [0], [0], [1], [0, 0, 1, 1], [], []>} : vector<16x8xf32>, vector<8x32xf32>, vector<16x32xf32> -> vector<16x32xf32>
    %54 = arith.addf %31, %53 : vector<16x32xf32>
    %55 = vector.extract_strided_slice %7 {offsets = [0, 0, 16], sizes = [2, 8, 8], strides = [1, 1, 1]} : vector<2x8x96xf32> to vector<2x8x8xf32>
    %56 = vector.extract_strided_slice %7 {offsets = [0, 0, 48], sizes = [2, 8, 8], strides = [1, 1, 1]} : vector<2x8x96xf32> to vector<2x8x8xf32>
    %57 = vector.extract_strided_slice %7 {offsets = [0, 0, 80], sizes = [2, 8, 8], strides = [1, 1, 1]} : vector<2x8x96xf32> to vector<2x8x8xf32>
    "tpu.trace_start"() <{level = 10 : i32, message = "bqd,bkd->bqk"}> : () -> ()
    %cst_22 = arith.constant dense<0.000000e+00> : vector<2x8x8xf32>
    %58 = tpu.matmul %55, %56, %cst_22 {dimension_numbers = #tpu.dot_dimension_numbers<[2], [2], [1], [1], [0, 0, 0, 1, 1, 1], [0], [0]>} : vector<2x8x8xf32>, vector<2x8x8xf32>, vector<2x8x8xf32> -> vector<2x8x8xf32>
    "tpu.trace_stop"() : () -> ()
    %cst_23 = arith.constant dense<0xFF800000> : vector<2x8xf32>
    %59 = vector.multi_reduction <maximumf>, %58, %cst_23 [2] : vector<2x8x8xf32> to vector<2x8xf32>
    %60 = vector.shape_cast %59 : vector<2x8xf32> to vector<2x8x1xf32>
    %61 = vector.broadcast %60 : vector<2x8x1xf32> to vector<2x8x8xf32>
    %62 = arith.subf %58, %61 : vector<2x8x8xf32>
    %63 = math.exp %62 : vector<2x8x8xf32>
    %cst_24 = arith.constant dense<0.000000e+00> : vector<2x8xf32>
    %64 = vector.multi_reduction <add>, %63, %cst_24 [2] : vector<2x8x8xf32> to vector<2x8xf32>
    %65 = vector.shape_cast %64 : vector<2x8xf32> to vector<2x8x1xf32>
    %66 = tpu.reciprocal %65 {approx = true} : vector<2x8x1xf32> -> vector<2x8x1xf32>
    %67 = arith.mulf %65, %66 : vector<2x8x1xf32>
    %cst_25 = arith.constant 2.000000e+00 : f32
    %68 = vector.broadcast %cst_25 : f32 to vector<2x8x1xf32>
    %69 = arith.subf %68, %67 : vector<2x8x1xf32>
    %70 = arith.mulf %66, %69 : vector<2x8x1xf32>
    %71 = vector.broadcast %70 : vector<2x8x1xf32> to vector<2x8x8xf32>
    %72 = arith.mulf %63, %71 : vector<2x8x8xf32>
    "tpu.trace_start"() <{level = 10 : i32, message = "bqk,bkd->bqd"}> : () -> ()
    %cst_26 = arith.constant dense<0.000000e+00> : vector<2x8x8xf32>
    %73 = tpu.matmul %72, %57, %cst_26 {dimension_numbers = #tpu.dot_dimension_numbers<[2], [1], [1], [2], [0, 0, 0, 1, 1, 2], [0], [0]>} : vector<2x8x8xf32>, vector<2x8x8xf32>, vector<2x8x8xf32> -> vector<2x8x8xf32>
    "tpu.trace_stop"() : () -> ()
    %74 = vector.shape_cast %73 : vector<2x8x8xf32> to vector<16x8xf32>
    %c16 = arith.constant 16 : index
    %c0_27 = arith.constant 0 : index
    %75 = vector.load %arg3[%c16, %c0_27] : memref<32x32xf32, #tpu.memory_space<vmem>>, vector<8x32xf32>
    %cst_28 = arith.constant dense<0.000000e+00> : vector<16x32xf32>
    %76 = tpu.matmul %74, %75, %cst_28 {dimension_numbers = #tpu.dot_dimension_numbers<[1], [0], [0], [1], [0, 0, 1, 1], [], []>} : vector<16x8xf32>, vector<8x32xf32>, vector<16x32xf32> -> vector<16x32xf32>
    %77 = arith.addf %54, %76 : vector<16x32xf32>
    %78 = vector.extract_strided_slice %7 {offsets = [0, 0, 24], sizes = [2, 8, 8], strides = [1, 1, 1]} : vector<2x8x96xf32> to vector<2x8x8xf32>
    %79 = vector.extract_strided_slice %7 {offsets = [0, 0, 56], sizes = [2, 8, 8], strides = [1, 1, 1]} : vector<2x8x96xf32> to vector<2x8x8xf32>
    %80 = vector.extract_strided_slice %7 {offsets = [0, 0, 88], sizes = [2, 8, 8], strides = [1, 1, 1]} : vector<2x8x96xf32> to vector<2x8x8xf32>
    "tpu.trace_start"() <{level = 10 : i32, message = "bqd,bkd->bqk"}> : () -> ()
    %cst_29 = arith.constant dense<0.000000e+00> : vector<2x8x8xf32>
    %81 = tpu.matmul %78, %79, %cst_29 {dimension_numbers = #tpu.dot_dimension_numbers<[2], [2], [1], [1], [0, 0, 0, 1, 1, 1], [0], [0]>} : vector<2x8x8xf32>, vector<2x8x8xf32>, vector<2x8x8xf32> -> vector<2x8x8xf32>
    "tpu.trace_stop"() : () -> ()
    %cst_30 = arith.constant dense<0xFF800000> : vector<2x8xf32>
    %82 = vector.multi_reduction <maximumf>, %81, %cst_30 [2] : vector<2x8x8xf32> to vector<2x8xf32>
    %83 = vector.shape_cast %82 : vector<2x8xf32> to vector<2x8x1xf32>
    %84 = vector.broadcast %83 : vector<2x8x1xf32> to vector<2x8x8xf32>
    %85 = arith.subf %81, %84 : vector<2x8x8xf32>
    %86 = math.exp %85 : vector<2x8x8xf32>
    %cst_31 = arith.constant dense<0.000000e+00> : vector<2x8xf32>
    %87 = vector.multi_reduction <add>, %86, %cst_31 [2] : vector<2x8x8xf32> to vector<2x8xf32>
    %88 = vector.shape_cast %87 : vector<2x8xf32> to vector<2x8x1xf32>
    %89 = tpu.reciprocal %88 {approx = true} : vector<2x8x1xf32> -> vector<2x8x1xf32>
    %90 = arith.mulf %88, %89 : vector<2x8x1xf32>
    %cst_32 = arith.constant 2.000000e+00 : f32
    %91 = vector.broadcast %cst_32 : f32 to vector<2x8x1xf32>
    %92 = arith.subf %91, %90 : vector<2x8x1xf32>
    %93 = arith.mulf %89, %92 : vector<2x8x1xf32>
    %94 = vector.broadcast %93 : vector<2x8x1xf32> to vector<2x8x8xf32>
    %95 = arith.mulf %86, %94 : vector<2x8x8xf32>
    "tpu.trace_start"() <{level = 10 : i32, message = "bqk,bkd->bqd"}> : () -> ()
    %cst_33 = arith.constant dense<0.000000e+00> : vector<2x8x8xf32>
    %96 = tpu.matmul %95, %80, %cst_33 {dimension_numbers = #tpu.dot_dimension_numbers<[2], [1], [1], [2], [0, 0, 0, 1, 1, 2], [0], [0]>} : vector<2x8x8xf32>, vector<2x8x8xf32>, vector<2x8x8xf32> -> vector<2x8x8xf32>
    "tpu.trace_stop"() : () -> ()
    %97 = vector.shape_cast %96 : vector<2x8x8xf32> to vector<16x8xf32>
    %c24 = arith.constant 24 : index
    %c0_34 = arith.constant 0 : index
    %98 = vector.load %arg3[%c24, %c0_34] : memref<32x32xf32, #tpu.memory_space<vmem>>, vector<8x32xf32>
    %cst_35 = arith.constant dense<0.000000e+00> : vector<16x32xf32>
    %99 = tpu.matmul %97, %98, %cst_35 {dimension_numbers = #tpu.dot_dimension_numbers<[1], [0], [0], [1], [0, 0, 1, 1], [], []>} : vector<16x8xf32>, vector<8x32xf32>, vector<16x32xf32> -> vector<16x32xf32>
    %100 = arith.addf %77, %99 : vector<16x32xf32>
    %c0_36 = arith.constant 0 : index
    %c0_37 = arith.constant 0 : index
    %101 = vector.load %arg4[%c0_36, %c0_37] : memref<1x32xf32, #tpu.memory_space<vmem>>, vector<1x32xf32>
    %102 = vector.broadcast %101 : vector<1x32xf32> to vector<16x32xf32>
    %103 = arith.addf %100, %102 : vector<16x32xf32>
    %104 = vector.shape_cast %103 : vector<16x32xf32> to vector<2x8x32xf32>
    %c0_38 = arith.constant 0 : index
    %c0_39 = arith.constant 0 : index
    %c0_40 = arith.constant 0 : index
    %105 = vector.load %arg5[%c0_38, %c0_39, %c0_40] : memref<2x8x32xf32, #tpu.memory_space<vmem>>, vector<2x8x32xf32>
    tpu.vector_store %arg5[%c0_38, %c0_39, %c0_40], %104 {strides = array<i32>} : memref<2x8x32xf32, #tpu.memory_space<vmem>>, vector<2x8x32xf32>,
    return
  }
}

</mosaic_0001>

<bundles_post_ra>
// kernel: tpu_custom_call.1
= control target key start
LH: loop header
LB: loop body
LE: loop exit
PB: predicated region body
PF: predicated region fallthrough
CT: control target
= control target key end

     0   :  { %10 = vsyncpa [#allocation3], 0  ;;  %s1167_s0 = inlined_call_operand.hbm [shape: f32[2,8,32], index: 0, kind: input, shape index: {}]   ;;  %s1168_s1 = inlined_call_operand.hbm [shape: f32[32,96], index: 1, kind: input, shape index: {}]   ;;  %s1169_s2 = inlined_call_operand.vmem [shape: f32[1,96], index: 2, kind: input, shape index: {}]   ;;  %s1170_s3 = inlined_call_operand.hbm [shape: f32[32,32], index: 3, kind: input, shape index: {}]   ;;  %s1171_s4 = inlined_call_operand.vmem [shape: f32[1,32], index: 4, kind: input, shape index: {}]   ;;  %s1172_s5 = inlined_call_operand.hbm [shape: f32[2,8,32], index: 5, kind: output, shape index: {}]  }
   0x1   :  { %11 = vsyncpa [#allocation6], 0 }
   0x2   :  { %12 = vsyncpa [#allocation4], 0  ;;  %s30_s20 = sshll.u32 %s1168_s1, 4  ;;  %s990_s21 = smov [#allocation5]   ;;  %s31_s20 = int_to_ptr.hbm [resolvable:$true] %s30_s20 }
   0x3   :  { %s32_s22 = sshll.u32 %s990_s21, 4  ;;  %s17_s25 = sshll.u32 %s1167_s0, 4  ;;  %s33_s22 = int_to_ptr.vmem [resolvable:$true] %s32_s22  ;;  %s18_s25 = int_to_ptr.hbm [resolvable:$true] %s17_s25 }
   0x4   :  { %s991_s26 = smov 128   ;;  %s992_s27 = smov 8  }
   0x5   :  { %38 = dma.hbm_to_vmem [thread:$0]  %s31_s20, 512, %s33_s22, [#allocation6], %s991_s26, %s991_s26, %s992_s27  }
   0x6   :  { %s993_s28 = smov [#allocation2]   ;;  %s45_s1 = sshll.u32 %s1170_s3, 4  ;;  %s46_s1 = int_to_ptr.hbm [resolvable:$true] %s45_s1 }
   0x7   :  { %s19_s29 = sshll.u32 %s993_s28, 4  ;;  %s994_s0 = smov [#allocation7]   ;;  %s20_s29 = int_to_ptr.vmem [resolvable:$true] %s19_s29 }
   0x8   :  { %25 = dma.hbm_to_vmem [thread:$0]  %s18_s25, 256, %s20_s29, [#allocation3], %s991_s26, %s991_s26, %s992_s27  }
   0x9   :  { %s47_s7 = sshll.u32 %s994_s0, 4  ;;  %s48_s7 = int_to_ptr.vmem [resolvable:$true] %s47_s7 }
   0xa   :  { %53 = dma.hbm_to_vmem [thread:$0]  %s46_s1, 512, %s48_s7, [#allocation6], %s991_s26, %s991_s26, %s992_s27  }
   0xb   :  { %984 = dma.done.wait [#allocation3], 256  }
   0xc   :  { %985 = vsyncadd [#allocation3], 4294967040 }
   0xd   :  { %986 = dma.done.wait [#allocation6], 1024  }
   0xe   :  { %987 = vsyncadd [#allocation6], 4294966272  ;;  %v73_v0 = vld [vmem:[#allocation5 + $0x18] sm:$0xff]  ;;  %v72_v1 = vld [vmem:[#allocation5 + $0x10] sm:$0xff]  ;;  %vm78_vm0 = vcmask 261120   ;;  %s995_s9 = smov 64  }
   0xf   :  { %97 = vmatpush.msra.mxu0 %v73_v0  ;;  %v71_v2 = vld [vmem:[#allocation5 + $0x8] sm:$0xff]  ;;  %v70_v3 = vld [vmem:[#allocation5] sm:$0xff]  ;;  %v68_v4 = vld [vmem:[#allocation2] sm:$0xff]  ;;  %s996_s10 = smov 96   ;;  %s997_s11 = smov 88   ;;  %vm111_vm1 = vcmask 64512  }
  0x10   :  { %v854_v5 = vld [vmem:[%s1169_s2] ss:$0 sm:$0xff]  ;;  %s998_s12 = smov 120   ;;  %v69_v11 = vld [vmem:[#allocation2 + $0x8] sm:$0xff]  ;;  %v243_v29 = vld [vmem:[#allocation7] sm:$0xff]  ;;  %s999_s2 = smov 80  }
  0x11   :  { %98 = vmatpush.msra.mxu0 %v72_v1  ;;  %s1000_s13 = smov 56   ;;  %s1001_s14 = smov 112  }
  0x12   :  { %s1002_s15 = smov 72   ;;  %s1003_s16 = smov 104  }
  0x13   :  { %99 = vmatpush.msra.mxu0 %v71_v2  ;;  %v380_v2 = vld [vmem:[#allocation7 + $0x8] sm:$0xff]  ;;  %s1004_s17 = smov 48   ;;  %s1005_s18 = smov 40  }
  0x14   :  { %s1006_s21 = smov [#allocation8]   ;;  %s789_s25 = sshll.u32 %s1172_s5, 4  ;;  %s790_s25 = int_to_ptr.hbm [resolvable:$true] %s789_s25 }
  0x15   :  { %100 = vmatpush.msra.mxu0 %v70_v3  ;;  %s787_s22 = sshll.u32 %s1006_s21, 4  ;;  %s788_s22 = int_to_ptr.vmem [resolvable:$true] %s787_s22 }
  0x16   :  { %803 = vmatmul.msk.f32.vlgmr.msra.gmra.mxu0 %vm78_vm0, %v68_v4 }
  0x17   :  { %431 = vmatpush.msrb.mxu0 %v243_v29 }
  0x1e   :  { %804 = vmatmul.msk.f32.gmra.mxu0 %vm78_vm0, %v69_v11 }
  0x93   :  { %v102_v6 = vpop.f32.mrf.mxu0 }
  0x94   :  { %v1059_v7 = vadd.f32 %v854_v5, %v102_v6 }
  0x96   :  { %191 = vrot.lane.b32.xlu2 %v1059_v7, %s995_s9  ;;  %109 = vrot.lane.b32.xlu0 %v1059_v7, %s996_s10 }
  0x9b   :  { %v105_v19 = vpop.f32.mrf.mxu0 }
  0x9c   :  { %v1075_v20 = vadd.f32 %v854_v5, %v105_v19 }
  0x9e   :  { %246 = vrot.lane.b32.xlu2 %v1059_v7, %s997_s11 }
  0xa6   :  { %244 = vrot.lane.b32.xlu2 %v1059_v7, %s998_s12 }
  0xf0   :  { %v192_v8 = vpop.permute.xlu2 %191 }
  0xf8   :  { %v247_v10 = vpop.permute.xlu2 %246 }
 0x100   :  { %v245_v27 = vpop.permute.xlu2 %244 }
 0x108   :  { %v110_v9 = vpop.permute.xlu0 %109 }
 0x109   :  { %805 = vmatpush.xpose.msk.msra.mxu1 %vm111_vm1, %v110_v9 }
 0x10c   :  { %806 = vmatmul.msk.f32.vlgmr.msra.gmra.mxu1 %vm111_vm1, %v1059_v7 }
 0x10d   :  { %212 = vmatpush.msrb.mxu1 %v192_v8 }
 0x10f   :  { %811 = vmatpush.xpose.msk.msra.mxu1 %vm111_vm1, %v247_v10 }
 0x189   :  { %v133_v12 = vpop.f32.mrf.mxu1 }
 0x18a   :  { %v163_v13 = vsel %vm111_vm1, %v133_v12, -inf }
 0x18b   :  { %164 = vmax.xlane.f32.xlu0 %v163_v13 }
 0x1fe   :  { %v165_v14 = vpop.xlane.xlu0 %164 }
 0x1ff   :  { %v169_v15 = vsub.f32 %v133_v12, %v165_v14 }
 0x201   :  { %v171_v16 = vmul.f32 1.442695, %v169_v15 }
 0x203   :  { %856 = vpow2.f32 %v171_v16 }
 0x209   :  { %v857_v17 = vpop.eup %856 }
 0x20a   :  { %v175_v18 = vsel %vm111_vm1, %v857_v17, 0.0 }
 0x20b   :  { %176 = vadd.xlane.f32.xlu1 %v175_v18 }
 0x224   :  { %137 = vrot.lane.b32.xlu1 %v1075_v20, %s996_s10 }
 0x27e   :  { %v177_v21 = vpop.xlane.xlu1 %176 }
 0x27f   :  { %858 = vrcp.f32 %v177_v21 }
 0x285   :  { %v859_v22 = vpop.eup %858 }
 0x286   :  { %v183_v23 = vmul.f32 %v859_v22, %v177_v21 }
 0x288   :  { %v185_v24 = vsub.f32 2.0, %v183_v23 }
 0x28a   :  { %v187_v25 = vmul.f32 %v859_v22, %v185_v24 }
 0x28c   :  { %v189_v26 = vmul.f32 %v857_v17, %v187_v25 }
 0x28e   :  { %809 = vmatmul.msk.f32.vlgmr.msrb.gmra.mxu1 %vm111_vm1, %v189_v26 }
 0x296   :  { %812 = vmatmul.msk.f32.vlgmr.msra.gmra.mxu1 %vm111_vm1, %v245_v27  ;;  %v138_v28 = vpop.permute.xlu1 %137 }
 0x297   :  { %807 = vmatpush.xpose.msk.msra.mxu2 %vm111_vm1, %v138_v28 }
 0x29a   :  { %808 = vmatmul.msk.f32.vlgmr.msra.gmra.mxu2 %vm111_vm1, %v1075_v20 }
 0x30b   :  { %v214_v30 = vpop.f32.mrf.mxu1 }
 0x30c   :  { %819 = vmatmul.msk.f32.vlgmr.msrb.gmra.mxu0 %vm111_vm1, %v214_v30 }
 0x313   :  { %v269_v31 = vpop.f32.mrf.mxu1 }
 0x314   :  { %v300_v32 = vsel %vm111_vm1, %v269_v31, -inf }
 0x315   :  { %301 = vmax.xlane.f32.xlu1 %v300_v32 }
 0x31d   :  { %v160_v33 = vpop.f32.mrf.mxu2 }
 0x31e   :  { %v166_v34 = vsel %vm111_vm1, %v160_v33, -inf }
 0x31f   :  { %167 = vmax.xlane.f32.xlu2 %v166_v34 }
 0x32e   :  { %272 = vrot.lane.b32.xlu1 %v1075_v20, %s998_s12 }
 0x337   :  { %217 = vrot.lane.b32.xlu2 %v1075_v20, %s995_s9 }
 0x33f   :  { %441 = vrot.lane.b32.xlu2 %v1059_v7, %s999_s2 }
 0x388   :  { %v302_v41 = vpop.xlane.xlu1 %301 }
 0x389   :  { %v306_v42 = vsub.f32 %v269_v31, %v302_v41 }
 0x38b   :  { %v308_v43 = vmul.f32 1.442695, %v306_v42 }
 0x392   :  { %v168_v35 = vpop.xlane.xlu2 %167 }
 0x393   :  { %v170_v36 = vsub.f32 %v160_v33, %v168_v35 }
 0x395   :  { %v173_v37 = vmul.f32 1.442695, %v170_v36 }
 0x397   :  { %860 = vpow2.f32 %v173_v37 }
 0x398   :  { %862 = vpow2.f32 %v308_v43 }
 0x39a   :  { %v218_v38 = vpop.permute.xlu2 %217 }
 0x39b   :  { %238 = vmatpush.msra.mxu3 %v218_v38 }
 0x39d   :  { %v861_v39 = vpop.eup %860 }
 0x39e   :  { %v178_v40 = vsel %vm111_vm1, %v861_v39, 0.0  ;;  %v863_v44 = vpop.eup %862 }
 0x39f   :  { %179 = vadd.xlane.f32.xlu0 %v178_v40  ;;  %v312_v45 = vsel %vm111_vm1, %v863_v44, 0.0 }
 0x3a0   :  { %v273_v53 = vpop.permute.xlu1 %272 }
 0x3a2   :  { %v442_v55 = vpop.permute.xlu2 %441 }
 0x3b3   :  { %274 = vrot.lane.b32.xlu0 %v1075_v20, %s997_s11 }
 0x3bb   :  { %328 = vrot.lane.b32.xlu0 %v1059_v7, %s1000_s13 }
 0x3e5   :  { %313 = vadd.xlane.f32.xlu0 %v312_v45  ;;  %v575_v45 = vld [vmem:[#allocation7 + $0x10] sm:$0xff] }
 0x3f9   :  { %439 = vrot.lane.b32.xlu0 %v1059_v7, %s1001_s14 }
 0x412   :  { %v180_v46 = vpop.xlane.xlu0 %179 }
 0x413   :  { %864 = vrcp.f32 %v180_v46 }
 0x419   :  { %v865_v47 = vpop.eup %864 }
 0x41a   :  { %v184_v48 = vmul.f32 %v865_v47, %v180_v46 }
 0x41c   :  { %v186_v49 = vsub.f32 2.0, %v184_v48 }
 0x41e   :  { %v188_v50 = vmul.f32 %v865_v47, %v186_v49 }
 0x420   :  { %v190_v51 = vmul.f32 %v861_v39, %v188_v50  ;;  %v1133_v39 = vpop.f32.mrf.mxu0 }
 0x422   :  { %810 = vmatmul.msk.f32.vlgmr.msra.gmra.mxu3 %vm111_vm1, %v190_v51 }
 0x425   :  { %v275_v52 = vpop.permute.xlu0 %274 }
 0x426   :  { %813 = vmatpush.xpose.msk.msrb.mxu2 %vm111_vm1, %v275_v52 }
 0x429   :  { %814 = vmatmul.msk.f32.vlgmr.msrb.gmra.mxu2 %vm111_vm1, %v273_v53 }
 0x42a   :  { %402 = vmatpush.msra.mxu2 %v380_v2 }
 0x42c   :  { %597 = vmatpush.msrb.mxu2 %v575_v45 }
 0x42d   :  { %v329_v54 = vpop.permute.xlu0 %328 }
 0x42e   :  { %349 = vmatpush.msrb.mxu3 %v329_v54 }
 0x430   :  { %821 = vmatpush.xpose.msk.msra.mxu3 %vm111_vm1, %v442_v55 }
 0x458   :  { %v314_v56 = vpop.xlane.xlu0 %313 }
 0x459   :  { %866 = vrcp.f32 %v314_v56 }
 0x45f   :  { %v867_v57 = vpop.eup %866 }
 0x460   :  { %v320_v58 = vmul.f32 %v867_v57, %v314_v56 }
 0x462   :  { %v322_v59 = vsub.f32 2.0, %v320_v58 }
 0x464   :  { %v324_v60 = vmul.f32 %v867_v57, %v322_v59 }
 0x466   :  { %v326_v61 = vmul.f32 %v863_v44, %v324_v60 }
 0x468   :  { %815 = vmatmul.msk.f32.vlgmr.msrb.gmra.mxu3 %vm111_vm1, %v326_v61 }
 0x46b   :  { %v440_v62 = vpop.permute.xlu0 %439 }
 0x470   :  { %822 = vmatmul.msk.f32.vlgmr.msra.gmra.mxu3 %vm111_vm1, %v440_v62 }
 0x4a5   :  { %v240_v63 = vpop.f32.mrf.mxu3 }
 0x4a6   :  { %820 = vmatmul.msk.f32.gmra.mxu0 %vm111_vm1, %v240_v63 }
 0x4ac   :  { %v297_v0 = vpop.f32.mrf.mxu2 }
 0x4ad   :  { %v303_v1 = vsel %vm111_vm1, %v297_v0, -inf }
 0x4ae   :  { %304 = vmax.xlane.f32.xlu2 %v303_v1 }
 0x4c6   :  { %467 = vrot.lane.b32.xlu2 %v1075_v20, %s1001_s14 }
 0x4eb   :  { %v351_v3 = vpop.f32.mrf.mxu3 }
 0x4ec   :  { %817 = vmatmul.msk.f32.vlgmr.msra.gmra.mxu2 %vm111_vm1, %v351_v3 }
 0x4f3   :  { %v464_v4 = vpop.f32.mrf.mxu3 }
 0x4f4   :  { %v495_v5 = vsel %vm111_vm1, %v464_v4, -inf }
 0x4f5   :  { %496 = vmax.xlane.f32.xlu1 %v495_v5 }
 0x50e   :  { %354 = vrot.lane.b32.xlu1 %v1075_v20, %s1000_s13 }
 0x516   :  { %609 = vrot.lane.b32.xlu1 %v1059_v7, %s1002_s15 }
 0x51e   :  { %635 = vrot.lane.b32.xlu1 %v1075_v20, %s1003_s16 }
 0x521   :  { %v305_v6 = vpop.xlane.xlu2 %304 }
 0x522   :  { %v307_v8 = vsub.f32 %v297_v0, %v305_v6 }
 0x523   :  { %v1136_v42 = vpop.f32.mrf.mxu0 }
 0x524   :  { %v310_v9 = vmul.f32 1.442695, %v307_v8 }
 0x526   :  { %868 = vpow2.f32 %v310_v9 }
 0x529   :  { %v468_v27 = vpop.permute.xlu2 %467 }
 0x52c   :  { %v869_v10 = vpop.eup %868 }
 0x52d   :  { %v315_v11 = vsel %vm111_vm1, %v869_v10, 0.0 }
 0x52e   :  { %316 = vadd.xlane.f32.xlu0 %v315_v11 }
 0x542   :  { %469 = vrot.lane.b32.xlu0 %v1075_v20, %s999_s2 }
 0x54a   :  { %523 = vrot.lane.b32.xlu0 %v1059_v7, %s1004_s17 }
 0x552   :  { %607 = vrot.lane.b32.xlu0 %v1059_v7, %s1003_s16 }
 0x568   :  { %v497_v12 = vpop.xlane.xlu1 %496 }
 0x569   :  { %v501_v13 = vsub.f32 %v464_v4, %v497_v12 }
 0x56b   :  { %v503_v14 = vmul.f32 1.442695, %v501_v13 }
 0x56d   :  { %870 = vpow2.f32 %v503_v14 }
 0x573   :  { %v871_v15 = vpop.eup %870 }
 0x574   :  { %v507_v16 = vsel %vm111_vm1, %v871_v15, 0.0 }
 0x575   :  { %508 = vadd.xlane.f32.xlu2 %v507_v16 }
 0x580   :  { %v355_v17 = vpop.permute.xlu1 %354 }
 0x581   :  { %375 = vmatpush.msrb.mxu1 %v355_v17 }
 0x588   :  { %v610_v18 = vpop.permute.xlu1 %609 }
 0x589   :  { %829 = vmatpush.xpose.msk.msra.mxu0 %vm111_vm1, %v610_v18 }
 0x58d   :  { %637 = vrot.lane.b32.xlu2 %v1075_v20, %s1002_s15 }
 0x590   :  { %v636_v37 = vpop.permute.xlu1 %635 }
 0x5a1   :  { %v317_v19 = vpop.xlane.xlu0 %316 }
 0x5a2   :  { %872 = vrcp.f32 %v317_v19 }
 0x5a8   :  { %v873_v21 = vpop.eup %872 }
 0x5a9   :  { %v321_v22 = vmul.f32 %v873_v21, %v317_v19 }
 0x5ab   :  { %v323_v23 = vsub.f32 2.0, %v321_v22 }
 0x5ad   :  { %v325_v24 = vmul.f32 %v873_v21, %v323_v23  ;;  %v743_v21 = vld [vmem:[#allocation7 + $0x18] sm:$0xff] }
 0x5af   :  { %v327_v25 = vmul.f32 %v869_v10, %v325_v24 }
 0x5b1   :  { %816 = vmatmul.msk.f32.vlgmr.msrb.gmra.mxu1 %vm111_vm1, %v327_v25  ;;  %v404_v25 = vpop.f32.mrf.mxu2 }
 0x5b4   :  { %v470_v26 = vpop.permute.xlu0 %469 }
 0x5b5   :  { %823 = vmatpush.xpose.msk.msra.mxu1 %vm111_vm1, %v470_v26 }
 0x5b9   :  { %824 = vmatmul.msk.f32.vlgmr.msra.gmra.mxu1 %vm111_vm1, %v468_v27 }
 0x5bc   :  { %v524_v28 = vpop.permute.xlu0 %523 }
 0x5bd   :  { %544 = vmatpush.msrb.mxu3 %v524_v28  ;;  %v434_v28 = vadd.f32 %v1133_v39, %v404_v25 }
 0x5c4   :  { %v608_v29 = vpop.permute.xlu0 %607 }
 0x5c5   :  { %830 = vmatmul.msk.f32.vlgmr.msra.gmra.mxu0 %vm111_vm1, %v608_v29 }
 0x5e8   :  { %v509_v30 = vpop.xlane.xlu2 %508 }
 0x5e9   :  { %874 = vrcp.f32 %v509_v30 }
 0x5ef   :  { %v875_v31 = vpop.eup %874 }
 0x5f0   :  { %v515_v32 = vmul.f32 %v875_v31, %v509_v30  ;;  %v638_v33 = vpop.permute.xlu2 %637  ;;  %v855_v30 = vld [vmem:[%s1171_s4] ss:$0 sm:$0xff] }
 0x5f1   :  { %831 = vmatpush.xpose.msk.msra.mxu3 %vm111_vm1, %v638_v33 }
 0x5f2   :  { %v517_v34 = vsub.f32 2.0, %v515_v32 }
 0x5f4   :  { %v519_v35 = vmul.f32 %v875_v31, %v517_v34 }
 0x5f6   :  { %v521_v36 = vmul.f32 %v871_v15, %v519_v35 }
 0x5f8   :  { %825 = vmatmul.msk.f32.vlgmr.msrb.gmra.mxu3 %vm111_vm1, %v521_v36 }
 0x5f9   :  { %765 = vmatpush.msrb.mxu3 %v743_v21 }
 0x600   :  { %832 = vmatmul.msk.f32.vlgmr.msra.gmra.mxu3 %vm111_vm1, %v636_v37 }
 0x62e   :  { %v377_v38 = vpop.f32.mrf.mxu1 }
 0x62f   :  { %818 = vmatmul.msk.f32.gmra.mxu2 %vm111_vm1, %v377_v38 }
 0x636   :  { %v492_v40 = vpop.f32.mrf.mxu1 }
 0x637   :  { %v498_v41 = vsel %vm111_vm1, %v492_v40, -inf }
 0x638   :  { %499 = vmax.xlane.f32.xlu2 %v498_v41 }
 0x642   :  { %v632_v43 = vpop.f32.mrf.mxu0 }
 0x643   :  { %v663_v44 = vsel %vm111_vm1, %v632_v43, -inf }
 0x644   :  { %664 = vmax.xlane.f32.xlu0 %v663_v44 }
 0x67b   :  { %v546_v46 = vpop.f32.mrf.mxu3 }
 0x67c   :  { %827 = vmatmul.msk.f32.vlgmr.msrb.gmra.mxu2 %vm111_vm1, %v546_v46 }
 0x683   :  { %v660_v47 = vpop.f32.mrf.mxu3 }
 0x684   :  { %v666_v48 = vsel %vm111_vm1, %v660_v47, -inf }
 0x685   :  { %667 = vmax.xlane.f32.xlu1 %v666_v48 }
 0x69e   :  { %549 = vrot.lane.b32.xlu1 %v1075_v20, %s1004_s17 }
 0x6ab   :  { %v500_v49 = vpop.xlane.xlu2 %499 }
 0x6ac   :  { %v502_v50 = vsub.f32 %v492_v40, %v500_v49 }
 0x6ae   :  { %v505_v51 = vmul.f32 1.442695, %v502_v50 }
 0x6b0   :  { %876 = vpow2.f32 %v505_v51 }
 0x6b2   :  { %v407_v26 = vpop.f32.mrf.mxu2 }
 0x6b3   :  { %v437_v35 = vadd.f32 %v1136_v42, %v407_v26 }
 0x6b6   :  { %v877_v52 = vpop.eup %876 }
 0x6b7   :  { %v665_v53 = vpop.xlane.xlu0 %664  ;;  %v510_v54 = vsel %vm111_vm1, %v877_v52, 0.0 }
 0x6b8   :  { %v669_v55 = vsub.f32 %v632_v43, %v665_v53  ;;  %511 = vadd.xlane.f32.xlu2 %v510_v54 }
 0x6ba   :  { %v671_v56 = vmul.f32 1.442695, %v669_v55 }
 0x6bc   :  { %878 = vpow2.f32 %v671_v56 }
 0x6c2   :  { %v879_v57 = vpop.eup %878 }
 0x6c3   :  { %v675_v58 = vsel %vm111_vm1, %v879_v57, 0.0 }
 0x6c4   :  { %676 = vadd.xlane.f32.xlu0 %v675_v58 }
 0x6d8   :  { %691 = vrot.lane.b32.xlu0 %v1059_v7, %s1005_s18 }
 0x6f8   :  { %v668_v59 = vpop.xlane.xlu1 %667 }
 0x6f9   :  { %v670_v60 = vsub.f32 %v660_v47, %v668_v59 }
 0x6fb   :  { %v673_v61 = vmul.f32 1.442695, %v670_v60 }
 0x6fd   :  { %880 = vpow2.f32 %v673_v61 }
 0x6ff   :  { %v599_v27 = vpop.f32.mrf.mxu2 }
 0x700   :  { %v605_v29 = vadd.f32 %v599_v27, %v434_v28 }
 0x703   :  { %v881_v62 = vpop.eup %880 }
 0x704   :  { %v678_v63 = vsel %vm111_vm1, %v881_v62, 0.0 }
 0x705   :  { %679 = vadd.xlane.f32.xlu2 %v678_v63 }
 0x710   :  { %v550_v0 = vpop.permute.xlu1 %549 }
 0x711   :  { %570 = vmatpush.msrb.mxu1 %v550_v0 }
 0x71d   :  { %717 = vrot.lane.b32.xlu2 %v1075_v20, %s1005_s18 }
 0x72b   :  { %v512_v1 = vpop.xlane.xlu2 %511 }
 0x72c   :  { %882 = vrcp.f32 %v512_v1 }
 0x732   :  { %v883_v2 = vpop.eup %882 }
 0x733   :  { %v516_v3 = vmul.f32 %v883_v2, %v512_v1 }
 0x735   :  { %v518_v4 = vsub.f32 2.0, %v516_v3 }
 0x737   :  { %v520_v5 = vmul.f32 %v883_v2, %v518_v4  ;;  %v677_v6 = vpop.xlane.xlu0 %676 }
 0x738   :  { %884 = vrcp.f32 %v677_v6 }
 0x739   :  { %v522_v7 = vmul.f32 %v877_v52, %v520_v5 }
 0x73b   :  { %826 = vmatmul.msk.f32.vlgmr.msrb.gmra.mxu1 %vm111_vm1, %v522_v7 }
 0x73e   :  { %v885_v8 = vpop.eup %884 }
 0x73f   :  { %v683_v9 = vmul.f32 %v885_v8, %v677_v6 }
 0x741   :  { %v685_v10 = vsub.f32 2.0, %v683_v9 }
 0x743   :  { %v687_v11 = vmul.f32 %v885_v8, %v685_v10 }
 0x745   :  { %v689_v12 = vmul.f32 %v879_v57, %v687_v11 }
 0x74a   :  { %v692_v13 = vpop.permute.xlu0 %691 }
 0x74b   :  { %712 = vmatpush.msra.mxu1 %v692_v13 }
 0x74c   :  { %833 = vmatmul.msk.f32.vlgmr.msra.gmra.mxu1 %vm111_vm1, %v689_v12 }
 0x778   :  { %v680_v20 = vpop.xlane.xlu2 %679 }
 0x779   :  { %886 = vrcp.f32 %v680_v20 }
 0x77f   :  { %v887_v14 = vpop.eup %886 }
 0x780   :  { %v684_v15 = vmul.f32 %v887_v14, %v680_v20  ;;  %v718_v16 = vpop.permute.xlu2 %717 }
 0x781   :  { %738 = vmatpush.msrb.mxu0 %v718_v16 }
 0x782   :  { %v686_v17 = vsub.f32 2.0, %v684_v15 }
 0x784   :  { %v688_v18 = vmul.f32 %v887_v14, %v686_v17 }
 0x786   :  { %v690_v19 = vmul.f32 %v881_v62, %v688_v18 }
 0x788   :  { %834 = vmatmul.msk.f32.vlgmr.msrb.gmra.mxu0 %vm111_vm1, %v690_v19 }
 0x7b8   :  { %v572_v22 = vpop.f32.mrf.mxu1 }
 0x7b9   :  { %828 = vmatmul.msk.f32.gmra.mxu2 %vm111_vm1, %v572_v22 }
 0x7c9   :  { %v714_v23 = vpop.f32.mrf.mxu1 }
 0x7ca   :  { %835 = vmatmul.msk.f32.vlgmr.msrb.gmra.mxu3 %vm111_vm1, %v714_v23 }
 0x805   :  { %v740_v24 = vpop.f32.mrf.mxu0 }
 0x806   :  { %836 = vmatmul.msk.f32.gmra.mxu3 %vm111_vm1, %v740_v24 }
 0x83c   :  { %v602_v34 = vpop.f32.mrf.mxu2 }
 0x83d   :  { %v606_v36 = vadd.f32 %v602_v34, %v437_v35 }
 0x84d   :  { %v767_v31 = vpop.f32.mrf.mxu3 }
 0x84e   :  { %v773_v32 = vadd.f32 %v767_v31, %v605_v29 }
 0x850   :  { %v779_v33 = vadd.f32 %v855_v30, %v773_v32 }
 0x852   :  { %781 = vst.msk [vmem:[#allocation8] sm:$0xff] %vm78_vm0, %v779_v33 }
 0x889   :  { %v770_v37 = vpop.f32.mrf.mxu3 }
 0x88a   :  { %v774_v38 = vadd.f32 %v770_v37, %v606_v36 }
 0x88c   :  { %v780_v39 = vadd.f32 %v855_v30, %v774_v38 }
 0x88e   :  { %782 = vst.msk [vmem:[#allocation8 + $0x8] sm:$0xff] %vm78_vm0, %v780_v39 }
 0x88f   :  { %795 = dma.vmem_to_hbm [thread:$0]  %s788_s22, 256, %s790_s25, [#allocation4], %s991_s26, %s991_s26, %s992_s27  }
 0x890   :  { %988 = dma.done.wait [#allocation4], 256  }
 0x891   :  { %989 = vsyncadd [#allocation4], 4294967040 }
 0x892   :  { %800 = vsyncpa [#allocation3], 1 }
 0x893   :  { %801 = vsyncpa [#allocation6], 1 }
 0x894   :  { %802 = vsyncpa [#allocation4], 1 }

</bundles_post_ra>
